<compile_context>
chip_gen: v7x
topology: tpu7x:2x2x1
jax: 0.10.0
libtpu: 0.0.40
codegen_flags: <defaults>
</compile_context>

<pallas_src>
import functools
import itertools
import math

import jax
import jax.numpy as jnp
import numpy as np
from jax.experimental import pallas as pl
from jax.experimental.pallas import tpu as pltpu

_MAX_BATCH_TILE = 32768   # lanes per grid step for large batches


def _round_up(x, m):
    return ((x + m - 1) // m) * m


def _choose_batch_tile(batch):
    # Small batch: a single tile (block dim == full array dim is always legal).
    if batch <= 1024:
        return batch
    # Large batch: lane-aligned tiles, capped at _MAX_BATCH_TILE, split so the
    # grid always has >= 2 steps (both v7x TensorCores get work).
    half = _round_up(pl.cdiv(batch, 2), 128)
    return min(_MAX_BATCH_TILE, half)


def afm_kernel(x_ref, prm_ref, out_ref, *, pairs, emb, att_pad, approx_recip):
    # x_ref  : (F, E, TB)  stacked field embeddings, batch on the lane axis
    # prm_ref: (R, E+3)    packed params: [:A,:E]=W^T, col E = b, col E+1 = h,
    #                      col E+2 rows :E = p   (zero padded elsewhere)
    # out_ref: (1, TB)
    E, A8 = emb, att_pad
    prm = prm_ref[...].astype(jnp.float32)
    wT = prm[:A8, :E]                               # (A8, E)  rows >= A are 0
    b = prm[:A8, E:E + 1]                           # (A8, 1)
    h = prm[:A8, E + 1:E + 2]                       # (A8, 1)
    pv = prm[:E, E + 2:E + 3]                       # (E, 1)   projection_p

    m = den = num = None
    for r, c in pairs:                              # static unroll, P = C(F,2)
        bi = x_ref[r].astype(jnp.float32) * x_ref[c].astype(jnp.float32)   # (E, TB)
        att = jnp.dot(wT, bi, preferred_element_type=jnp.float32) + b      # (A8, TB)
        att = jnp.maximum(att, 0.0)                 # relu; zero-padded rows stay 0
        s = jnp.sum(h * att, axis=0, keepdims=True)     # (1, TB) attention logit
        pb = jnp.sum(pv * bi, axis=0, keepdims=True)    # (1, TB) p^T bi  (p fused here)
        if m is None:                               # first pair
            m, den, num = s, jnp.ones_like(s), pb
        else:                                       # online softmax update
            m_new = jnp.maximum(m, s)
            a_old = jnp.exp(m - m_new)
            a_new = jnp.exp(s - m_new)
            den = a_old * den + a_new
            num = a_old * num + a_new * pb
            m = m_new

    inv = pl.reciprocal(den, approx=approx_recip)
    out_ref[...] = (num * inv).astype(out_ref.dtype)


def afm_layer_pallas_stacked(x, attention_W, attention_b, projection_h,
                             projection_p, *, allow_input_fusion=True,
                             approx_reciprocal=False):
    """x: (F, E, B) stacked field embeddings. Returns (B, 1) float32."""
    F, E, B = x.shape
    assert F >= 2, "AFM needs at least two fields"
    A = attention_W.shape[1]
    assert attention_W.shape[0] == E
    pairs = tuple(itertools.combinations(range(F), 2))
    P = len(pairs)

    # Pack the tiny parameters into one zero-padded block (sublane aligned).
    A8 = _round_up(A, 8)
    R = max(A8, E)
    C = E + 3
    prm = jnp.zeros((R, C), jnp.float32)
    prm = prm.at[:A, :E].set(jnp.asarray(attention_W, jnp.float32).T)
    prm = prm.at[:A, E].set(jnp.asarray(attention_b, jnp.float32).reshape(A))
    prm = prm.at[:A, E + 1].set(jnp.asarray(projection_h, jnp.float32).reshape(A))
    prm = prm.at[:E, E + 2].set(jnp.asarray(projection_p, jnp.float32).reshape(E))

    tb = _choose_batch_tile(B)
    grid = (pl.cdiv(B, tb),)

    grid_spec = pl.GridSpec(
        grid=grid,
        in_specs=[
            pl.BlockSpec((F, E, tb), lambda i: (0, 0, i)),
            pl.BlockSpec((R, C), lambda i: (0, 0)),      # constant index -> DMA'd once
        ],
        out_specs=pl.BlockSpec((1, tb), lambda i: (0, i)),
    )

    # VMEM budget from actual live buffers: double-buffered blocks plus the
    # O(1) in-kernel f32 intermediates of the online softmax (padded layouts).
    lane_tb = max(_round_up(tb, 128), 128)
    sub_e = max(_round_up(E, 8), 8)
    itemsize = jnp.dtype(x.dtype).itemsize
    in_bytes = 2 * F * sub_e * lane_tb * itemsize        # double-buffered x tile
    out_bytes = 2 * 8 * lane_tb * 4                      # (1, tb) out, sublane padded
    prm_bytes = 2 * _round_up(R, 8) * _round_up(C, 128) * 4
    interm_bytes = (3 * sub_e + 2 * A8 + 12 * 8) * lane_tb * 4
    need = in_bytes + out_bytes + prm_bytes + interm_bytes
    vmem_limit = int(min(48 * 1024 * 1024,
                         max(32 * 1024 * 1024, (need * 5) // 4)))

    flops_row = P * (3 * E + 2 * E * A8 + 4 * A8 + 12) + 4
    cost = pl.CostEstimate(
        flops=int(B * flops_row),
        transcendentals=int(B * 2 * P),
        bytes_accessed=int(x.size * itemsize + B * 4 + R * C * 4),
    )

    n_inputs = 2
    compiler_params = pltpu.CompilerParams(
        dimension_semantics=("parallel",),
        vmem_limit_bytes=vmem_limit,
        # Let XLA fold the (F, E, B) stack/transpose producer into the pallas
        # input instead of a separate HBM round trip (effective under jit).
        allow_input_fusion=[bool(allow_input_fusion)] + [False] * (n_inputs - 1),
    )

    out = pl.pallas_call(
        functools.partial(afm_kernel, pairs=pairs, emb=E, att_pad=A8,
                          approx_recip=approx_reciprocal),
        grid_spec=grid_spec,
        out_shape=jax.ShapeDtypeStruct((1, B), jnp.float32),
        compiler_params=compiler_params,
        cost_estimate=cost,
    )(x, prm)

    return out.reshape(B, 1)


def afm_layer_pallas(embeds_vec_list, attention_W, attention_b, projection_h,
                     projection_p, **kwargs):
    """embeds_vec_list: list of (B, 1, E) field embeddings. Returns (B, 1)."""
    # (B, F, E) -> (F, E, B): batch on the 128-lane axis.  Ideally upstream
    # produces this layout directly (call afm_layer_pallas_stacked); under jit
    # allow_input_fusion lets XLA fold this layout change into the pallas
    # input DMA so the full B*F*E tensor is not round-tripped through HBM.
    x = jnp.concatenate(embeds_vec_list, axis=1)     # (B, F, E)
    x = jnp.transpose(x, (1, 2, 0))                  # (F, E, B)
    return afm_layer_pallas_stacked(x, attention_W, attention_b, projection_h,
                                    projection_p, **kwargs)


def afm_layer_ref(embeds_vec_list, attention_W, attention_b, projection_h,
                  projection_p):
    """Pure-JAX reference mirroring the PyTorch forward (eval mode)."""
    rows, cols = [], []
    for r, c in itertools.combinations(embeds_vec_list, 2):
        rows.append(r)
        cols.append(c)
    p_cat = jnp.concatenate(rows, axis=1)
    q_cat = jnp.concatenate(cols, axis=1)
    bi = p_cat * q_cat                                             # (B, P, E)
    att = jax.nn.relu(jnp.tensordot(bi, attention_W, axes=([-1], [0]))
                      + attention_b)                               # (B, P, A)
    logits = jnp.tensordot(att, projection_h, axes=([-1], [0]))    # (B, P, 1)
    score = jax.nn.softmax(logits, axis=1)                         # (B, P, 1)
    attn_out = jnp.sum(score * bi, axis=1)                         # (B, E)
    return jnp.tensordot(attn_out, projection_p, axes=([-1], [0]))  # (B, 1)


def xavier_normal(key, shape):
    fan_in, fan_out = shape[0], shape[1]
    std = math.sqrt(2.0 / (fan_in + fan_out))
    return std * jax.random.normal(key, shape, dtype=jnp.float32)


if __name__ == "__main__":
    # Small, forward-consistent shapes.
    batch = 2
    num_fields = 4          # -> P = C(4,2) = 6 pairwise interactions
    embed = 8               # in_features / embedding_size
    attention_factor = 4

    root = jax.random.PRNGKey(0)
    k_in, k_w, k_h, k_p = jax.random.split(root, 4)

    # Inputs: list of (batch, 1, embed) field embeddings.
    field_keys = jax.random.split(k_in, num_fields)
    embeds_vec_list = [
        jax.random.normal(k, (batch, 1, embed), dtype=jnp.float32)
        for k in field_keys
    ]

    # Deterministic parameter init matching nn.init in __init__.
    attention_W = xavier_normal(k_w, (embed, attention_factor))
    attention_b = jnp.zeros((attention_factor,), dtype=jnp.float32)
    projection_h = xavier_normal(k_h, (attention_factor, 1))
    projection_p = xavier_normal(k_p, (embed, 1))

    run = jax.jit(afm_layer_pallas)
    try:
        out = jax.block_until_ready(
            run(embeds_vec_list, attention_W, attention_b, projection_h,
                projection_p))
    except Exception:
        # allow_input_fusion is advisory; fall back to the plain path if this
        # XLA build rejects fusing the stack/transpose producer.
        run = jax.jit(functools.partial(afm_layer_pallas,
                                        allow_input_fusion=False))
        out = jax.block_until_ready(
            run(embeds_vec_list, attention_W, attention_b, projection_h,
                projection_p))

    ref = jax.block_until_ready(
        afm_layer_ref(embeds_vec_list, attention_W, attention_b,
                      projection_h, projection_p))

    assert out.shape == (batch, 1)
    np.testing.assert_allclose(np.asarray(out), np.asarray(ref),
                               rtol=1e-5, atol=1e-5)
    print("KERNEL_OK")
</pallas_src>

<mosaic_0001>
module attributes {stable_mosaic.version = 11 : i64} {
  func.func @afm_kernel(%arg0: i32, %arg1: memref<4x8x2xf32, #tpu.memory_space<vmem>>, %arg2: memref<8x11xf32, #tpu.memory_space<vmem>>, %arg3: memref<1x2xf32, #tpu.memory_space<vmem>>) attributes {dimension_semantics = [#tpu.dimension_semantics<parallel>], iteration_bounds = array<i64: 1>, scalar_prefetch = 0 : i64, scratch_operands = 0 : i64, tpu.core_type = #tpu.core_type<tc>, window_params = [{transform_indices = @transform_0, window_bounds = array<i64: 4, 8, 2>}, {pipeline_mode = #tpu.pipeline_mode<synchronous>, transform_indices = @transform_1, window_bounds = array<i64: 8, 11>}, {transform_indices = @transform_2, window_bounds = array<i64: 1, 2>}]} {
    %c0 = arith.constant 0 : index
    %c0_0 = arith.constant 0 : index
    %0 = vector.load %arg2[%c0, %c0_0] : memref<8x11xf32, #tpu.memory_space<vmem>>, vector<8x11xf32>
    %1 = vector.extract_strided_slice %0 {offsets = [0, 0], sizes = [8, 8], strides = [1, 1]} : vector<8x11xf32> to vector<8x8xf32>
    %2 = vector.extract_strided_slice %0 {offsets = [0, 8], sizes = [8, 1], strides = [1, 1]} : vector<8x11xf32> to vector<8x1xf32>
    %3 = vector.extract_strided_slice %0 {offsets = [0, 9], sizes = [8, 1], strides = [1, 1]} : vector<8x11xf32> to vector<8x1xf32>
    %4 = vector.extract_strided_slice %0 {offsets = [0, 10], sizes = [8, 1], strides = [1, 1]} : vector<8x11xf32> to vector<8x1xf32>
    %c0_1 = arith.constant 0 : index
    %c0_2 = arith.constant 0 : index
    %c0_3 = arith.constant 0 : index
    %5 = vector.load %arg1[%c0_1, %c0_2, %c0_3] : memref<4x8x2xf32, #tpu.memory_space<vmem>>, vector<1x8x2xf32>
    %6 = vector.shape_cast %5 : vector<1x8x2xf32> to vector<8x2xf32>
    %c1 = arith.constant 1 : index
    %c0_4 = arith.constant 0 : index
    %c0_5 = arith.constant 0 : index
    %7 = vector.load %arg1[%c1, %c0_4, %c0_5] : memref<4x8x2xf32, #tpu.memory_space<vmem>>, vector<1x8x2xf32>
    %8 = vector.shape_cast %7 : vector<1x8x2xf32> to vector<8x2xf32>
    %9 = arith.mulf %6, %8 : vector<8x2xf32>
    %cst = arith.constant dense<0.000000e+00> : vector<8x2xf32>
    %10 = tpu.matmul %1, %9, %cst {dimension_numbers = #tpu.dot_dimension_numbers<[1], [0], [0], [1], [0, 0, 1, 1], [], []>} : vector<8x8xf32>, vector<8x2xf32>, vector<8x2xf32> -> vector<8x2xf32>
    %11 = vector.broadcast %2 : vector<8x1xf32> to vector<8x2xf32>
    %12 = arith.addf %10, %11 : vector<8x2xf32>
    %cst_6 = arith.constant 0.000000e+00 : f32
    %13 = vector.broadcast %cst_6 : f32 to vector<8x2xf32>
    %14 = arith.maximumf %12, %13 : vector<8x2xf32>
    %15 = vector.broadcast %3 : vector<8x1xf32> to vector<8x2xf32>
    %16 = arith.mulf %15, %14 : vector<8x2xf32>
    %cst_7 = arith.constant dense<0.000000e+00> : vector<2xf32>
    %17 = vector.multi_reduction <add>, %16, %cst_7 [0] : vector<8x2xf32> to vector<2xf32>
    %18 = vector.shape_cast %17 : vector<2xf32> to vector<1x2xf32>
    %19 = vector.broadcast %4 : vector<8x1xf32> to vector<8x2xf32>
    %20 = arith.mulf %19, %9 : vector<8x2xf32>
    %cst_8 = arith.constant dense<0.000000e+00> : vector<2xf32>
    %21 = vector.multi_reduction <add>, %20, %cst_8 [0] : vector<8x2xf32> to vector<2xf32>
    %22 = vector.shape_cast %21 : vector<2xf32> to vector<1x2xf32>
    %cst_9 = arith.constant 1.000000e+00 : f32
    %23 = vector.broadcast %cst_9 : f32 to vector<1x2xf32>
    %c0_10 = arith.constant 0 : index
    %c0_11 = arith.constant 0 : index
    %c0_12 = arith.constant 0 : index
    %24 = vector.load %arg1[%c0_10, %c0_11, %c0_12] : memref<4x8x2xf32, #tpu.memory_space<vmem>>, vector<1x8x2xf32>
    %25 = vector.shape_cast %24 : vector<1x8x2xf32> to vector<8x2xf32>
    %c2 = arith.constant 2 : index
    %c0_13 = arith.constant 0 : index
    %c0_14 = arith.constant 0 : index
    %26 = vector.load %arg1[%c2, %c0_13, %c0_14] : memref<4x8x2xf32, #tpu.memory_space<vmem>>, vector<1x8x2xf32>
    %27 = vector.shape_cast %26 : vector<1x8x2xf32> to vector<8x2xf32>
    %28 = arith.mulf %25, %27 : vector<8x2xf32>
    %cst_15 = arith.constant dense<0.000000e+00> : vector<8x2xf32>
    %29 = tpu.matmul %1, %28, %cst_15 {dimension_numbers = #tpu.dot_dimension_numbers<[1], [0], [0], [1], [0, 0, 1, 1], [], []>} : vector<8x8xf32>, vector<8x2xf32>, vector<8x2xf32> -> vector<8x2xf32>
    %30 = vector.broadcast %2 : vector<8x1xf32> to vector<8x2xf32>
    %31 = arith.addf %29, %30 : vector<8x2xf32>
    %cst_16 = arith.constant 0.000000e+00 : f32
    %32 = vector.broadcast %cst_16 : f32 to vector<8x2xf32>
    %33 = arith.maximumf %31, %32 : vector<8x2xf32>
    %34 = vector.broadcast %3 : vector<8x1xf32> to vector<8x2xf32>
    %35 = arith.mulf %34, %33 : vector<8x2xf32>
    %cst_17 = arith.constant dense<0.000000e+00> : vector<2xf32>
    %36 = vector.multi_reduction <add>, %35, %cst_17 [0] : vector<8x2xf32> to vector<2xf32>
    %37 = vector.shape_cast %36 : vector<2xf32> to vector<1x2xf32>
    %38 = vector.broadcast %4 : vector<8x1xf32> to vector<8x2xf32>
    %39 = arith.mulf %38, %28 : vector<8x2xf32>
    %cst_18 = arith.constant dense<0.000000e+00> : vector<2xf32>
    %40 = vector.multi_reduction <add>, %39, %cst_18 [0] : vector<8x2xf32> to vector<2xf32>
    %41 = vector.shape_cast %40 : vector<2xf32> to vector<1x2xf32>
    %42 = arith.maximumf %18, %37 : vector<1x2xf32>
    %43 = arith.subf %18, %42 : vector<1x2xf32>
    %44 = math.exp %43 : vector<1x2xf32>
    %45 = arith.subf %37, %42 : vector<1x2xf32>
    %46 = math.exp %45 : vector<1x2xf32>
    %47 = arith.mulf %44, %23 : vector<1x2xf32>
    %48 = arith.addf %47, %46 : vector<1x2xf32>
    %49 = arith.mulf %44, %22 : vector<1x2xf32>
    %50 = arith.mulf %46, %41 : vector<1x2xf32>
    %51 = arith.addf %49, %50 : vector<1x2xf32>
    %c0_19 = arith.constant 0 : index
    %c0_20 = arith.constant 0 : index
    %c0_21 = arith.constant 0 : index
    %52 = vector.load %arg1[%c0_19, %c0_20, %c0_21] : memref<4x8x2xf32, #tpu.memory_space<vmem>>, vector<1x8x2xf32>
    %53 = vector.shape_cast %52 : vector<1x8x2xf32> to vector<8x2xf32>
    %c3 = arith.constant 3 : index
    %c0_22 = arith.constant 0 : index
    %c0_23 = arith.constant 0 : index
    %54 = vector.load %arg1[%c3, %c0_22, %c0_23] : memref<4x8x2xf32, #tpu.memory_space<vmem>>, vector<1x8x2xf32>
    %55 = vector.shape_cast %54 : vector<1x8x2xf32> to vector<8x2xf32>
    %56 = arith.mulf %53, %55 : vector<8x2xf32>
    %cst_24 = arith.constant dense<0.000000e+00> : vector<8x2xf32>
    %57 = tpu.matmul %1, %56, %cst_24 {dimension_numbers = #tpu.dot_dimension_numbers<[1], [0], [0], [1], [0, 0, 1, 1], [], []>} : vector<8x8xf32>, vector<8x2xf32>, vector<8x2xf32> -> vector<8x2xf32>
    %58 = vector.broadcast %2 : vector<8x1xf32> to vector<8x2xf32>
    %59 = arith.addf %57, %58 : vector<8x2xf32>
    %cst_25 = arith.constant 0.000000e+00 : f32
    %60 = vector.broadcast %cst_25 : f32 to vector<8x2xf32>
    %61 = arith.maximumf %59, %60 : vector<8x2xf32>
    %62 = vector.broadcast %3 : vector<8x1xf32> to vector<8x2xf32>
    %63 = arith.mulf %62, %61 : vector<8x2xf32>
    %cst_26 = arith.constant dense<0.000000e+00> : vector<2xf32>
    %64 = vector.multi_reduction <add>, %63, %cst_26 [0] : vector<8x2xf32> to vector<2xf32>
    %65 = vector.shape_cast %64 : vector<2xf32> to vector<1x2xf32>
    %66 = vector.broadcast %4 : vector<8x1xf32> to vector<8x2xf32>
    %67 = arith.mulf %66, %56 : vector<8x2xf32>
    %cst_27 = arith.constant dense<0.000000e+00> : vector<2xf32>
    %68 = vector.multi_reduction <add>, %67, %cst_27 [0] : vector<8x2xf32> to vector<2xf32>
    %69 = vector.shape_cast %68 : vector<2xf32> to vector<1x2xf32>
    %70 = arith.maximumf %42, %65 : vector<1x2xf32>
    %71 = arith.subf %42, %70 : vector<1x2xf32>
    %72 = math.exp %71 : vector<1x2xf32>
    %73 = arith.subf %65, %70 : vector<1x2xf32>
    %74 = math.exp %73 : vector<1x2xf32>
    %75 = arith.mulf %72, %48 : vector<1x2xf32>
    %76 = arith.addf %75, %74 : vector<1x2xf32>
    %77 = arith.mulf %72, %51 : vector<1x2xf32>
    %78 = arith.mulf %74, %69 : vector<1x2xf32>
    %79 = arith.addf %77, %78 : vector<1x2xf32>
    %c1_28 = arith.constant 1 : index
    %c0_29 = arith.constant 0 : index
    %c0_30 = arith.constant 0 : index
    %80 = vector.load %arg1[%c1_28, %c0_29, %c0_30] : memref<4x8x2xf32, #tpu.memory_space<vmem>>, vector<1x8x2xf32>
    %81 = vector.shape_cast %80 : vector<1x8x2xf32> to vector<8x2xf32>
    %c2_31 = arith.constant 2 : index
    %c0_32 = arith.constant 0 : index
    %c0_33 = arith.constant 0 : index
    %82 = vector.load %arg1[%c2_31, %c0_32, %c0_33] : memref<4x8x2xf32, #tpu.memory_space<vmem>>, vector<1x8x2xf32>
    %83 = vector.shape_cast %82 : vector<1x8x2xf32> to vector<8x2xf32>
    %84 = arith.mulf %81, %83 : vector<8x2xf32>
    %cst_34 = arith.constant dense<0.000000e+00> : vector<8x2xf32>
    %85 = tpu.matmul %1, %84, %cst_34 {dimension_numbers = #tpu.dot_dimension_numbers<[1], [0], [0], [1], [0, 0, 1, 1], [], []>} : vector<8x8xf32>, vector<8x2xf32>, vector<8x2xf32> -> vector<8x2xf32>
    %86 = vector.broadcast %2 : vector<8x1xf32> to vector<8x2xf32>
    %87 = arith.addf %85, %86 : vector<8x2xf32>
    %cst_35 = arith.constant 0.000000e+00 : f32
    %88 = vector.broadcast %cst_35 : f32 to vector<8x2xf32>
    %89 = arith.maximumf %87, %88 : vector<8x2xf32>
    %90 = vector.broadcast %3 : vector<8x1xf32> to vector<8x2xf32>
    %91 = arith.mulf %90, %89 : vector<8x2xf32>
    %cst_36 = arith.constant dense<0.000000e+00> : vector<2xf32>
    %92 = vector.multi_reduction <add>, %91, %cst_36 [0] : vector<8x2xf32> to vector<2xf32>
    %93 = vector.shape_cast %92 : vector<2xf32> to vector<1x2xf32>
    %94 = vector.broadcast %4 : vector<8x1xf32> to vector<8x2xf32>
    %95 = arith.mulf %94, %84 : vector<8x2xf32>
    %cst_37 = arith.constant dense<0.000000e+00> : vector<2xf32>
    %96 = vector.multi_reduction <add>, %95, %cst_37 [0] : vector<8x2xf32> to vector<2xf32>
    %97 = vector.shape_cast %96 : vector<2xf32> to vector<1x2xf32>
    %98 = arith.maximumf %70, %93 : vector<1x2xf32>
    %99 = arith.subf %70, %98 : vector<1x2xf32>
    %100 = math.exp %99 : vector<1x2xf32>
    %101 = arith.subf %93, %98 : vector<1x2xf32>
    %102 = math.exp %101 : vector<1x2xf32>
    %103 = arith.mulf %100, %76 : vector<1x2xf32>
    %104 = arith.addf %103, %102 : vector<1x2xf32>
    %105 = arith.mulf %100, %79 : vector<1x2xf32>
    %106 = arith.mulf %102, %97 : vector<1x2xf32>
    %107 = arith.addf %105, %106 : vector<1x2xf32>
    %c1_38 = arith.constant 1 : index
    %c0_39 = arith.constant 0 : index
    %c0_40 = arith.constant 0 : index
    %108 = vector.load %arg1[%c1_38, %c0_39, %c0_40] : memref<4x8x2xf32, #tpu.memory_space<vmem>>, vector<1x8x2xf32>
    %109 = vector.shape_cast %108 : vector<1x8x2xf32> to vector<8x2xf32>
    %c3_41 = arith.constant 3 : index
    %c0_42 = arith.constant 0 : index
    %c0_43 = arith.constant 0 : index
    %110 = vector.load %arg1[%c3_41, %c0_42, %c0_43] : memref<4x8x2xf32, #tpu.memory_space<vmem>>, vector<1x8x2xf32>
    %111 = vector.shape_cast %110 : vector<1x8x2xf32> to vector<8x2xf32>
    %112 = arith.mulf %109, %111 : vector<8x2xf32>
    %cst_44 = arith.constant dense<0.000000e+00> : vector<8x2xf32>
    %113 = tpu.matmul %1, %112, %cst_44 {dimension_numbers = #tpu.dot_dimension_numbers<[1], [0], [0], [1], [0, 0, 1, 1], [], []>} : vector<8x8xf32>, vector<8x2xf32>, vector<8x2xf32> -> vector<8x2xf32>
    %114 = vector.broadcast %2 : vector<8x1xf32> to vector<8x2xf32>
    %115 = arith.addf %113, %114 : vector<8x2xf32>
    %cst_45 = arith.constant 0.000000e+00 : f32
    %116 = vector.broadcast %cst_45 : f32 to vector<8x2xf32>
    %117 = arith.maximumf %115, %116 : vector<8x2xf32>
    %118 = vector.broadcast %3 : vector<8x1xf32> to vector<8x2xf32>
    %119 = arith.mulf %118, %117 : vector<8x2xf32>
    %cst_46 = arith.constant dense<0.000000e+00> : vector<2xf32>
    %120 = vector.multi_reduction <add>, %119, %cst_46 [0] : vector<8x2xf32> to vector<2xf32>
    %121 = vector.shape_cast %120 : vector<2xf32> to vector<1x2xf32>
    %122 = vector.broadcast %4 : vector<8x1xf32> to vector<8x2xf32>
    %123 = arith.mulf %122, %112 : vector<8x2xf32>
    %cst_47 = arith.constant dense<0.000000e+00> : vector<2xf32>
    %124 = vector.multi_reduction <add>, %123, %cst_47 [0] : vector<8x2xf32> to vector<2xf32>
    %125 = vector.shape_cast %124 : vector<2xf32> to vector<1x2xf32>
    %126 = arith.maximumf %98, %121 : vector<1x2xf32>
    %127 = arith.subf %98, %126 : vector<1x2xf32>
    %128 = math.exp %127 : vector<1x2xf32>
    %129 = arith.subf %121, %126 : vector<1x2xf32>
    %130 = math.exp %129 : vector<1x2xf32>
    %131 = arith.mulf %128, %104 : vector<1x2xf32>
    %132 = arith.addf %131, %130 : vector<1x2xf32>
    %133 = arith.mulf %128, %107 : vector<1x2xf32>
    %134 = arith.mulf %130, %125 : vector<1x2xf32>
    %135 = arith.addf %133, %134 : vector<1x2xf32>
    %c2_48 = arith.constant 2 : index
    %c0_49 = arith.constant 0 : index
    %c0_50 = arith.constant 0 : index
    %136 = vector.load %arg1[%c2_48, %c0_49, %c0_50] : memref<4x8x2xf32, #tpu.memory_space<vmem>>, vector<1x8x2xf32>
    %137 = vector.shape_cast %136 : vector<1x8x2xf32> to vector<8x2xf32>
    %c3_51 = arith.constant 3 : index
    %c0_52 = arith.constant 0 : index
    %c0_53 = arith.constant 0 : index
    %138 = vector.load %arg1[%c3_51, %c0_52, %c0_53] : memref<4x8x2xf32, #tpu.memory_space<vmem>>, vector<1x8x2xf32>
    %139 = vector.shape_cast %138 : vector<1x8x2xf32> to vector<8x2xf32>
    %140 = arith.mulf %137, %139 : vector<8x2xf32>
    %cst_54 = arith.constant dense<0.000000e+00> : vector<8x2xf32>
    %141 = tpu.matmul %1, %140, %cst_54 {dimension_numbers = #tpu.dot_dimension_numbers<[1], [0], [0], [1], [0, 0, 1, 1], [], []>} : vector<8x8xf32>, vector<8x2xf32>, vector<8x2xf32> -> vector<8x2xf32>
    %142 = vector.broadcast %2 : vector<8x1xf32> to vector<8x2xf32>
    %143 = arith.addf %141, %142 : vector<8x2xf32>
    %cst_55 = arith.constant 0.000000e+00 : f32
    %144 = vector.broadcast %cst_55 : f32 to vector<8x2xf32>
    %145 = arith.maximumf %143, %144 : vector<8x2xf32>
    %146 = vector.broadcast %3 : vector<8x1xf32> to vector<8x2xf32>
    %147 = arith.mulf %146, %145 : vector<8x2xf32>
    %cst_56 = arith.constant dense<0.000000e+00> : vector<2xf32>
    %148 = vector.multi_reduction <add>, %147, %cst_56 [0] : vector<8x2xf32> to vector<2xf32>
    %149 = vector.shape_cast %148 : vector<2xf32> to vector<1x2xf32>
    %150 = vector.broadcast %4 : vector<8x1xf32> to vector<8x2xf32>
    %151 = arith.mulf %150, %140 : vector<8x2xf32>
    %cst_57 = arith.constant dense<0.000000e+00> : vector<2xf32>
    %152 = vector.multi_reduction <add>, %151, %cst_57 [0] : vector<8x2xf32> to vector<2xf32>
    %153 = vector.shape_cast %152 : vector<2xf32> to vector<1x2xf32>
    %154 = arith.maximumf %126, %149 : vector<1x2xf32>
    %155 = arith.subf %126, %154 : vector<1x2xf32>
    %156 = math.exp %155 : vector<1x2xf32>
    %157 = arith.subf %149, %154 : vector<1x2xf32>
    %158 = math.exp %157 : vector<1x2xf32>
    %159 = arith.mulf %156, %132 : vector<1x2xf32>
    %160 = arith.addf %159, %158 : vector<1x2xf32>
    %161 = arith.mulf %156, %135 : vector<1x2xf32>
    %162 = arith.mulf %158, %153 : vector<1x2xf32>
    %163 = arith.addf %161, %162 : vector<1x2xf32>
    %164 = tpu.reciprocal %160 : vector<1x2xf32> -> vector<1x2xf32>
    %165 = arith.mulf %163, %164 : vector<1x2xf32>
    %c0_58 = arith.constant 0 : index
    %c0_59 = arith.constant 0 : index
    %166 = vector.load %arg3[%c0_58, %c0_59] : memref<1x2xf32, #tpu.memory_space<vmem>>, vector<1x2xf32>
    tpu.vector_store %arg3[%c0_58, %c0_59], %165 {strides = array<i32>} : memref<1x2xf32, #tpu.memory_space<vmem>>, vector<1x2xf32>,
    return
  }
  func.func @transform_0(%arg0: i32) -> (i32, i32, i32) {
    %c0_i32 = arith.constant 0 : i32
    %c0_i32_0 = arith.constant 0 : i32
    %c0_i32_1 = arith.constant 0 : i32
    return %c0_i32, %c0_i32_0, %arg0 : i32, i32, i32
  }
  func.func @transform_1(%arg0: i32) -> (i32, i32) {
    %c0_i32 = arith.constant 0 : i32
    %c0_i32_0 = arith.constant 0 : i32
    %c0_i32_1 = arith.constant 0 : i32
    return %c0_i32, %c0_i32_0 : i32, i32
  }
  func.func @transform_2(%arg0: i32) -> (i32, i32) {
    %c0_i32 = arith.constant 0 : i32
    %c0_i32_0 = arith.constant 0 : i32
    return %c0_i32, %arg0 : i32, i32
  }
}

module attributes {stable_mosaic.version = 11 : i64} {
  func.func @afm_kernel(%arg0: i32, %arg1: memref<4x8x2xf32, #tpu.memory_space<vmem>>, %arg2: memref<8x11xf32, #tpu.memory_space<vmem>>, %arg3: memref<1x2xf32, #tpu.memory_space<vmem>>) attributes {dimension_semantics = [#tpu.dimension_semantics<parallel>], iteration_bounds = array<i64: 1>, scalar_prefetch = 0 : i64, scratch_operands = 0 : i64, tpu.core_type = #tpu.core_type<tc>, window_params = [{transform_indices = @transform_0, window_bounds = array<i64: 4, 8, 2>}, {pipeline_mode = #tpu.pipeline_mode<synchronous>, transform_indices = @transform_1, window_bounds = array<i64: 8, 11>}, {transform_indices = @transform_2, window_bounds = array<i64: 1, 2>}]} {
    %c0 = arith.constant 0 : index
    %c0_0 = arith.constant 0 : index
    %0 = vector.load %arg2[%c0, %c0_0] : memref<8x11xf32, #tpu.memory_space<vmem>>, vector<8x11xf32>
    %1 = vector.extract_strided_slice %0 {offsets = [0, 0], sizes = [8, 8], strides = [1, 1]} : vector<8x11xf32> to vector<8x8xf32>
    %2 = vector.extract_strided_slice %0 {offsets = [0, 8], sizes = [8, 1], strides = [1, 1]} : vector<8x11xf32> to vector<8x1xf32>
    %3 = vector.extract_strided_slice %0 {offsets = [0, 9], sizes = [8, 1], strides = [1, 1]} : vector<8x11xf32> to vector<8x1xf32>
    %4 = vector.extract_strided_slice %0 {offsets = [0, 10], sizes = [8, 1], strides = [1, 1]} : vector<8x11xf32> to vector<8x1xf32>
    %c0_1 = arith.constant 0 : index
    %c0_2 = arith.constant 0 : index
    %c0_3 = arith.constant 0 : index
    %5 = vector.load %arg1[%c0_1, %c0_2, %c0_3] : memref<4x8x2xf32, #tpu.memory_space<vmem>>, vector<1x8x2xf32>
    %6 = vector.shape_cast %5 : vector<1x8x2xf32> to vector<8x2xf32>
    %c1 = arith.constant 1 : index
    %c0_4 = arith.constant 0 : index
    %c0_5 = arith.constant 0 : index
    %7 = vector.load %arg1[%c1, %c0_4, %c0_5] : memref<4x8x2xf32, #tpu.memory_space<vmem>>, vector<1x8x2xf32>
    %8 = vector.shape_cast %7 : vector<1x8x2xf32> to vector<8x2xf32>
    %9 = arith.mulf %6, %8 : vector<8x2xf32>
    %cst = arith.constant dense<0.000000e+00> : vector<8x2xf32>
    %10 = tpu.matmul %1, %9, %cst {dimension_numbers = #tpu.dot_dimension_numbers<[1], [0], [0], [1], [0, 0, 1, 1], [], []>} : vector<8x8xf32>, vector<8x2xf32>, vector<8x2xf32> -> vector<8x2xf32>
    %11 = vector.broadcast %2 : vector<8x1xf32> to vector<8x2xf32>
    %12 = arith.addf %10, %11 : vector<8x2xf32>
    %cst_6 = arith.constant 0.000000e+00 : f32
    %13 = vector.broadcast %cst_6 : f32 to vector<8x2xf32>
    %14 = arith.maximumf %12, %13 : vector<8x2xf32>
    %15 = vector.broadcast %3 : vector<8x1xf32> to vector<8x2xf32>
    %16 = arith.mulf %15, %14 : vector<8x2xf32>
    %cst_7 = arith.constant dense<0.000000e+00> : vector<2xf32>
    %17 = vector.multi_reduction <add>, %16, %cst_7 [0] : vector<8x2xf32> to vector<2xf32>
    %18 = vector.shape_cast %17 : vector<2xf32> to vector<1x2xf32>
    %19 = vector.broadcast %4 : vector<8x1xf32> to vector<8x2xf32>
    %20 = arith.mulf %19, %9 : vector<8x2xf32>
    %cst_8 = arith.constant dense<0.000000e+00> : vector<2xf32>
    %21 = vector.multi_reduction <add>, %20, %cst_8 [0] : vector<8x2xf32> to vector<2xf32>
    %22 = vector.shape_cast %21 : vector<2xf32> to vector<1x2xf32>
    %cst_9 = arith.constant 1.000000e+00 : f32
    %23 = vector.broadcast %cst_9 : f32 to vector<1x2xf32>
    %c0_10 = arith.constant 0 : index
    %c0_11 = arith.constant 0 : index
    %c0_12 = arith.constant 0 : index
    %24 = vector.load %arg1[%c0_10, %c0_11, %c0_12] : memref<4x8x2xf32, #tpu.memory_space<vmem>>, vector<1x8x2xf32>
    %25 = vector.shape_cast %24 : vector<1x8x2xf32> to vector<8x2xf32>
    %c2 = arith.constant 2 : index
    %c0_13 = arith.constant 0 : index
    %c0_14 = arith.constant 0 : index
    %26 = vector.load %arg1[%c2, %c0_13, %c0_14] : memref<4x8x2xf32, #tpu.memory_space<vmem>>, vector<1x8x2xf32>
    %27 = vector.shape_cast %26 : vector<1x8x2xf32> to vector<8x2xf32>
    %28 = arith.mulf %25, %27 : vector<8x2xf32>
    %cst_15 = arith.constant dense<0.000000e+00> : vector<8x2xf32>
    %29 = tpu.matmul %1, %28, %cst_15 {dimension_numbers = #tpu.dot_dimension_numbers<[1], [0], [0], [1], [0, 0, 1, 1], [], []>} : vector<8x8xf32>, vector<8x2xf32>, vector<8x2xf32> -> vector<8x2xf32>
    %30 = vector.broadcast %2 : vector<8x1xf32> to vector<8x2xf32>
    %31 = arith.addf %29, %30 : vector<8x2xf32>
    %cst_16 = arith.constant 0.000000e+00 : f32
    %32 = vector.broadcast %cst_16 : f32 to vector<8x2xf32>
    %33 = arith.maximumf %31, %32 : vector<8x2xf32>
    %34 = vector.broadcast %3 : vector<8x1xf32> to vector<8x2xf32>
    %35 = arith.mulf %34, %33 : vector<8x2xf32>
    %cst_17 = arith.constant dense<0.000000e+00> : vector<2xf32>
    %36 = vector.multi_reduction <add>, %35, %cst_17 [0] : vector<8x2xf32> to vector<2xf32>
    %37 = vector.shape_cast %36 : vector<2xf32> to vector<1x2xf32>
    %38 = vector.broadcast %4 : vector<8x1xf32> to vector<8x2xf32>
    %39 = arith.mulf %38, %28 : vector<8x2xf32>
    %cst_18 = arith.constant dense<0.000000e+00> : vector<2xf32>
    %40 = vector.multi_reduction <add>, %39, %cst_18 [0] : vector<8x2xf32> to vector<2xf32>
    %41 = vector.shape_cast %40 : vector<2xf32> to vector<1x2xf32>
    %42 = arith.maximumf %18, %37 : vector<1x2xf32>
    %43 = arith.subf %18, %42 : vector<1x2xf32>
    %44 = math.exp %43 : vector<1x2xf32>
    %45 = arith.subf %37, %42 : vector<1x2xf32>
    %46 = math.exp %45 : vector<1x2xf32>
    %47 = arith.mulf %44, %23 : vector<1x2xf32>
    %48 = arith.addf %47, %46 : vector<1x2xf32>
    %49 = arith.mulf %44, %22 : vector<1x2xf32>
    %50 = arith.mulf %46, %41 : vector<1x2xf32>
    %51 = arith.addf %49, %50 : vector<1x2xf32>
    %c0_19 = arith.constant 0 : index
    %c0_20 = arith.constant 0 : index
    %c0_21 = arith.constant 0 : index
    %52 = vector.load %arg1[%c0_19, %c0_20, %c0_21] : memref<4x8x2xf32, #tpu.memory_space<vmem>>, vector<1x8x2xf32>
    %53 = vector.shape_cast %52 : vector<1x8x2xf32> to vector<8x2xf32>
    %c3 = arith.constant 3 : index
    %c0_22 = arith.constant 0 : index
    %c0_23 = arith.constant 0 : index
    %54 = vector.load %arg1[%c3, %c0_22, %c0_23] : memref<4x8x2xf32, #tpu.memory_space<vmem>>, vector<1x8x2xf32>
    %55 = vector.shape_cast %54 : vector<1x8x2xf32> to vector<8x2xf32>
    %56 = arith.mulf %53, %55 : vector<8x2xf32>
    %cst_24 = arith.constant dense<0.000000e+00> : vector<8x2xf32>
    %57 = tpu.matmul %1, %56, %cst_24 {dimension_numbers = #tpu.dot_dimension_numbers<[1], [0], [0], [1], [0, 0, 1, 1], [], []>} : vector<8x8xf32>, vector<8x2xf32>, vector<8x2xf32> -> vector<8x2xf32>
    %58 = vector.broadcast %2 : vector<8x1xf32> to vector<8x2xf32>
    %59 = arith.addf %57, %58 : vector<8x2xf32>
    %cst_25 = arith.constant 0.000000e+00 : f32
    %60 = vector.broadcast %cst_25 : f32 to vector<8x2xf32>
    %61 = arith.maximumf %59, %60 : vector<8x2xf32>
    %62 = vector.broadcast %3 : vector<8x1xf32> to vector<8x2xf32>
    %63 = arith.mulf %62, %61 : vector<8x2xf32>
    %cst_26 = arith.constant dense<0.000000e+00> : vector<2xf32>
    %64 = vector.multi_reduction <add>, %63, %cst_26 [0] : vector<8x2xf32> to vector<2xf32>
    %65 = vector.shape_cast %64 : vector<2xf32> to vector<1x2xf32>
    %66 = vector.broadcast %4 : vector<8x1xf32> to vector<8x2xf32>
    %67 = arith.mulf %66, %56 : vector<8x2xf32>
    %cst_27 = arith.constant dense<0.000000e+00> : vector<2xf32>
    %68 = vector.multi_reduction <add>, %67, %cst_27 [0] : vector<8x2xf32> to vector<2xf32>
    %69 = vector.shape_cast %68 : vector<2xf32> to vector<1x2xf32>
    %70 = arith.maximumf %42, %65 : vector<1x2xf32>
    %71 = arith.subf %42, %70 : vector<1x2xf32>
    %72 = math.exp %71 : vector<1x2xf32>
    %73 = arith.subf %65, %70 : vector<1x2xf32>
    %74 = math.exp %73 : vector<1x2xf32>
    %75 = arith.mulf %72, %48 : vector<1x2xf32>
    %76 = arith.addf %75, %74 : vector<1x2xf32>
    %77 = arith.mulf %72, %51 : vector<1x2xf32>
    %78 = arith.mulf %74, %69 : vector<1x2xf32>
    %79 = arith.addf %77, %78 : vector<1x2xf32>
    %c1_28 = arith.constant 1 : index
    %c0_29 = arith.constant 0 : index
    %c0_30 = arith.constant 0 : index
    %80 = vector.load %arg1[%c1_28, %c0_29, %c0_30] : memref<4x8x2xf32, #tpu.memory_space<vmem>>, vector<1x8x2xf32>
    %81 = vector.shape_cast %80 : vector<1x8x2xf32> to vector<8x2xf32>
    %c2_31 = arith.constant 2 : index
    %c0_32 = arith.constant 0 : index
    %c0_33 = arith.constant 0 : index
    %82 = vector.load %arg1[%c2_31, %c0_32, %c0_33] : memref<4x8x2xf32, #tpu.memory_space<vmem>>, vector<1x8x2xf32>
    %83 = vector.shape_cast %82 : vector<1x8x2xf32> to vector<8x2xf32>
    %84 = arith.mulf %81, %83 : vector<8x2xf32>
    %cst_34 = arith.constant dense<0.000000e+00> : vector<8x2xf32>
    %85 = tpu.matmul %1, %84, %cst_34 {dimension_numbers = #tpu.dot_dimension_numbers<[1], [0], [0], [1], [0, 0, 1, 1], [], []>} : vector<8x8xf32>, vector<8x2xf32>, vector<8x2xf32> -> vector<8x2xf32>
    %86 = vector.broadcast %2 : vector<8x1xf32> to vector<8x2xf32>
    %87 = arith.addf %85, %86 : vector<8x2xf32>
    %cst_35 = arith.constant 0.000000e+00 : f32
    %88 = vector.broadcast %cst_35 : f32 to vector<8x2xf32>
    %89 = arith.maximumf %87, %88 : vector<8x2xf32>
    %90 = vector.broadcast %3 : vector<8x1xf32> to vector<8x2xf32>
    %91 = arith.mulf %90, %89 : vector<8x2xf32>
    %cst_36 = arith.constant dense<0.000000e+00> : vector<2xf32>
    %92 = vector.multi_reduction <add>, %91, %cst_36 [0] : vector<8x2xf32> to vector<2xf32>
    %93 = vector.shape_cast %92 : vector<2xf32> to vector<1x2xf32>
    %94 = vector.broadcast %4 : vector<8x1xf32> to vector<8x2xf32>
    %95 = arith.mulf %94, %84 : vector<8x2xf32>
    %cst_37 = arith.constant dense<0.000000e+00> : vector<2xf32>
    %96 = vector.multi_reduction <add>, %95, %cst_37 [0] : vector<8x2xf32> to vector<2xf32>
    %97 = vector.shape_cast %96 : vector<2xf32> to vector<1x2xf32>
    %98 = arith.maximumf %70, %93 : vector<1x2xf32>
    %99 = arith.subf %70, %98 : vector<1x2xf32>
    %100 = math.exp %99 : vector<1x2xf32>
    %101 = arith.subf %93, %98 : vector<1x2xf32>
    %102 = math.exp %101 : vector<1x2xf32>
    %103 = arith.mulf %100, %76 : vector<1x2xf32>
    %104 = arith.addf %103, %102 : vector<1x2xf32>
    %105 = arith.mulf %100, %79 : vector<1x2xf32>
    %106 = arith.mulf %102, %97 : vector<1x2xf32>
    %107 = arith.addf %105, %106 : vector<1x2xf32>
    %c1_38 = arith.constant 1 : index
    %c0_39 = arith.constant 0 : index
    %c0_40 = arith.constant 0 : index
    %108 = vector.load %arg1[%c1_38, %c0_39, %c0_40] : memref<4x8x2xf32, #tpu.memory_space<vmem>>, vector<1x8x2xf32>
    %109 = vector.shape_cast %108 : vector<1x8x2xf32> to vector<8x2xf32>
    %c3_41 = arith.constant 3 : index
    %c0_42 = arith.constant 0 : index
    %c0_43 = arith.constant 0 : index
    %110 = vector.load %arg1[%c3_41, %c0_42, %c0_43] : memref<4x8x2xf32, #tpu.memory_space<vmem>>, vector<1x8x2xf32>
    %111 = vector.shape_cast %110 : vector<1x8x2xf32> to vector<8x2xf32>
    %112 = arith.mulf %109, %111 : vector<8x2xf32>
    %cst_44 = arith.constant dense<0.000000e+00> : vector<8x2xf32>
    %113 = tpu.matmul %1, %112, %cst_44 {dimension_numbers = #tpu.dot_dimension_numbers<[1], [0], [0], [1], [0, 0, 1, 1], [], []>} : vector<8x8xf32>, vector<8x2xf32>, vector<8x2xf32> -> vector<8x2xf32>
    %114 = vector.broadcast %2 : vector<8x1xf32> to vector<8x2xf32>
    %115 = arith.addf %113, %114 : vector<8x2xf32>
    %cst_45 = arith.constant 0.000000e+00 : f32
    %116 = vector.broadcast %cst_45 : f32 to vector<8x2xf32>
    %117 = arith.maximumf %115, %116 : vector<8x2xf32>
    %118 = vector.broadcast %3 : vector<8x1xf32> to vector<8x2xf32>
    %119 = arith.mulf %118, %117 : vector<8x2xf32>
    %cst_46 = arith.constant dense<0.000000e+00> : vector<2xf32>
    %120 = vector.multi_reduction <add>, %119, %cst_46 [0] : vector<8x2xf32> to vector<2xf32>
    %121 = vector.shape_cast %120 : vector<2xf32> to vector<1x2xf32>
    %122 = vector.broadcast %4 : vector<8x1xf32> to vector<8x2xf32>
    %123 = arith.mulf %122, %112 : vector<8x2xf32>
    %cst_47 = arith.constant dense<0.000000e+00> : vector<2xf32>
    %124 = vector.multi_reduction <add>, %123, %cst_47 [0] : vector<8x2xf32> to vector<2xf32>
    %125 = vector.shape_cast %124 : vector<2xf32> to vector<1x2xf32>
    %126 = arith.maximumf %98, %121 : vector<1x2xf32>
    %127 = arith.subf %98, %126 : vector<1x2xf32>
    %128 = math.exp %127 : vector<1x2xf32>
    %129 = arith.subf %121, %126 : vector<1x2xf32>
    %130 = math.exp %129 : vector<1x2xf32>
    %131 = arith.mulf %128, %104 : vector<1x2xf32>
    %132 = arith.addf %131, %130 : vector<1x2xf32>
    %133 = arith.mulf %128, %107 : vector<1x2xf32>
    %134 = arith.mulf %130, %125 : vector<1x2xf32>
    %135 = arith.addf %133, %134 : vector<1x2xf32>
    %c2_48 = arith.constant 2 : index
    %c0_49 = arith.constant 0 : index
    %c0_50 = arith.constant 0 : index
    %136 = vector.load %arg1[%c2_48, %c0_49, %c0_50] : memref<4x8x2xf32, #tpu.memory_space<vmem>>, vector<1x8x2xf32>
    %137 = vector.shape_cast %136 : vector<1x8x2xf32> to vector<8x2xf32>
    %c3_51 = arith.constant 3 : index
    %c0_52 = arith.constant 0 : index
    %c0_53 = arith.constant 0 : index
    %138 = vector.load %arg1[%c3_51, %c0_52, %c0_53] : memref<4x8x2xf32, #tpu.memory_space<vmem>>, vector<1x8x2xf32>
    %139 = vector.shape_cast %138 : vector<1x8x2xf32> to vector<8x2xf32>
    %140 = arith.mulf %137, %139 : vector<8x2xf32>
    %cst_54 = arith.constant dense<0.000000e+00> : vector<8x2xf32>
    %141 = tpu.matmul %1, %140, %cst_54 {dimension_numbers = #tpu.dot_dimension_numbers<[1], [0], [0], [1], [0, 0, 1, 1], [], []>} : vector<8x8xf32>, vector<8x2xf32>, vector<8x2xf32> -> vector<8x2xf32>
    %142 = vector.broadcast %2 : vector<8x1xf32> to vector<8x2xf32>
    %143 = arith.addf %141, %142 : vector<8x2xf32>
    %cst_55 = arith.constant 0.000000e+00 : f32
    %144 = vector.broadcast %cst_55 : f32 to vector<8x2xf32>
    %145 = arith.maximumf %143, %144 : vector<8x2xf32>
    %146 = vector.broadcast %3 : vector<8x1xf32> to vector<8x2xf32>
    %147 = arith.mulf %146, %145 : vector<8x2xf32>
    %cst_56 = arith.constant dense<0.000000e+00> : vector<2xf32>
    %148 = vector.multi_reduction <add>, %147, %cst_56 [0] : vector<8x2xf32> to vector<2xf32>
    %149 = vector.shape_cast %148 : vector<2xf32> to vector<1x2xf32>
    %150 = vector.broadcast %4 : vector<8x1xf32> to vector<8x2xf32>
    %151 = arith.mulf %150, %140 : vector<8x2xf32>
    %cst_57 = arith.constant dense<0.000000e+00> : vector<2xf32>
    %152 = vector.multi_reduction <add>, %151, %cst_57 [0] : vector<8x2xf32> to vector<2xf32>
    %153 = vector.shape_cast %152 : vector<2xf32> to vector<1x2xf32>
    %154 = arith.maximumf %126, %149 : vector<1x2xf32>
    %155 = arith.subf %126, %154 : vector<1x2xf32>
    %156 = math.exp %155 : vector<1x2xf32>
    %157 = arith.subf %149, %154 : vector<1x2xf32>
    %158 = math.exp %157 : vector<1x2xf32>
    %159 = arith.mulf %156, %132 : vector<1x2xf32>
    %160 = arith.addf %159, %158 : vector<1x2xf32>
    %161 = arith.mulf %156, %135 : vector<1x2xf32>
    %162 = arith.mulf %158, %153 : vector<1x2xf32>
    %163 = arith.addf %161, %162 : vector<1x2xf32>
    %164 = tpu.reciprocal %160 : vector<1x2xf32> -> vector<1x2xf32>
    %165 = arith.mulf %163, %164 : vector<1x2xf32>
    %c0_58 = arith.constant 0 : index
    %c0_59 = arith.constant 0 : index
    %166 = vector.load %arg3[%c0_58, %c0_59] : memref<1x2xf32, #tpu.memory_space<vmem>>, vector<1x2xf32>
    tpu.vector_store %arg3[%c0_58, %c0_59], %165 {strides = array<i32>} : memref<1x2xf32, #tpu.memory_space<vmem>>, vector<1x2xf32>,
    return
  }
  func.func @transform_0(%arg0: i32) -> (i32, i32, i32) {
    %c0_i32 = arith.constant 0 : i32
    %c0_i32_0 = arith.constant 0 : i32
    %c0_i32_1 = arith.constant 0 : i32
    return %c0_i32, %c0_i32_0, %arg0 : i32, i32, i32
  }
  func.func @transform_1(%arg0: i32) -> (i32, i32) {
    %c0_i32 = arith.constant 0 : i32
    %c0_i32_0 = arith.constant 0 : i32
    %c0_i32_1 = arith.constant 0 : i32
    return %c0_i32, %c0_i32_0 : i32, i32
  }
  func.func @transform_2(%arg0: i32) -> (i32, i32) {
    %c0_i32 = arith.constant 0 : i32
    %c0_i32_0 = arith.constant 0 : i32
    return %c0_i32, %arg0 : i32, i32
  }
}

</mosaic_0001>

<bundles_post_ra>
// kernel: afm_layer_pallas.2
= control target key start
LH: loop header
LB: loop body
LE: loop exit
PB: predicated region body
PF: predicated region fallthrough
CT: control target
= control target key end

     0   :  { %v767_v3 = vmov 0.0   ;;  %vm40_vm0 = vcmask 64512   ;;  %s854_s0 = inlined_call_operand.vmem [shape: f32[8,11], index: 0, kind: input, shape index: {}]   ;;  %s855_s1 = inlined_call_operand.vmem [shape: f32[2,4,8], index: 1, kind: input, shape index: {}]   ;;  %s856_s2 = inlined_call_operand.hbm [shape: f32[1,2], index: 2, kind: output, shape index: {}]  }
   0x1   :  { %v12_v0 = vld [vmem:[%s855_s1] sm:$0xff]  ;;  %v660_v1 = vld [vmem:[%s855_s1 + $0x8] sm:$0xff]  ;;  %v662_v2 = vld [vmem:[%s855_s1 + $0x18] sm:$0xff]  ;;  %681 = vmatprep.subr.mxu0 %v767_v3  ;;  %686 = vmatprep.subr.mxu1 %v767_v3 }
   0x2   :  { %v34_v4 = vmul.f32 %v660_v1, %v12_v0  ;;  %v661_v5 = vld [vmem:[%s855_s1 + $0x10] sm:$0xff]  ;;  %v30_v6 = vld [vmem:[%s854_s0] sm:$0xff] }
   0x3   :  { %7 = vsyncpa [#allocation3], 0  ;;  %v242_v7 = vmul.f32 %v662_v2, %v12_v0  ;;  %vm768_vm1 = vmmov 0   ;;  %v141_v8 = vmul.f32 %v661_v5, %v12_v0  ;;  %v342_v9 = vmul.f32 %v661_v5, %v660_v1  ;;  %s772_s0 = smov [#allocation2]  }
   0x4   :  { %683 = vmatprep.mubr.msk.f32.mxu0 %vm768_vm1, %v767_v3  ;;  %688 = vmatprep.mubr.msk.f32.mxu1 %vm768_vm1, %v767_v3  ;;  %v769_v10 = vmov 8   ;;  %v442_v11 = vmul.f32 %v662_v2, %v660_v1  ;;  %v807_v12 = vmul.f32 %v662_v2, %v661_v5  ;;  %v770_v13 = vmov 10   ;;  %s652_s1 = sshll.u32 %s772_s0, 4  ;;  %s653_s1 = int_to_ptr.vmem [resolvable:$true] %s652_s1 }
   0x5   :  { %682 = vmatpush3.msra.mxu0 %v34_v4  ;;  %717 = vset.pattern.permute.xlu0 %v769_v10  ;;  %v771_v14 = vmov 9   ;;  %vm119_vm2 = vcmask 15360   ;;  %vm644_vm3 = vcmask 8192   ;;  %s743_s19 = scalar_lea.vmem %s653_s1, 16  ;;  %s747_s20 = scalar_lea.vmem %s653_s1, 32 }
   0x6   :  { %687 = vmatpush3.msra.mxu1 %v141_v8  ;;  %684 = vmatmul.mubr.msk.f32.vlgmr.msra.gmra.mrb[0].mxu0 %vm40_vm0, %v30_v6  ;;  %p744_p0 = scmp.ne.s32.totalorder %s653_s1, %s743_s19  ;;  %p748_p1 = scmp.lt.s32.totalorder %s653_s1, %s653_s1 }
   0x7   :  { %689 = vmatmul.mubr.msk.f32.vlgmr.msra.gmra.mrb[0].mxu1 %vm40_vm0, %v30_v6  ;;  %691 = vmatprep.subr.mxu0 %v767_v3  ;;  %p749_p2 = scmp.lt.s32.totalorder %s747_s20, %s743_s19 }
   0x8   :  { %692 = vmatpush3.msra.mxu0 %v242_v7  ;;  %696 = vmatprep.subr.mxu1 %v767_v3 }
   0x9   :  { %693 = vmatprep.mubr.msk.f32.mxu0 %vm768_vm1, %v767_v3  ;;  %697 = vmatpush3.msra.mxu1 %v342_v9  ;;  %p750_p3 = por %p749_p2, %p748_p1 }
   0xa   :  { %698 = vmatprep.mubr.msk.f32.mxu1 %vm768_vm1, %v767_v3  ;;  %694 = vmatmul.mubr.msk.f32.vlgmr.msra.gmra.mrb[2].mxu0 %vm40_vm0, %v30_v6 }
   0xb   :  { %699 = vmatmul.mubr.msk.f32.vlgmr.msra.gmra.mrb[2].mxu1 %vm40_vm0, %v30_v6  ;;  %701 = vmatprep.subr.mxu0 %v767_v3  ;;  %p751_p4 = pnand %p750_p3, %p744_p0 }
   0xc   :  { %706 = vmatprep.subr.mxu1 %v767_v3  ;;  %702 = vmatpush3.msra.mxu0 %v442_v11 }
   0xd   :  { %703 = vmatprep.mubr.msk.f32.mxu0 %vm768_vm1, %v767_v3  ;;  %707 = vmatpush3.msra.mxu1 %v807_v12 }
   0xe   :  { %708 = vmatprep.mubr.msk.f32.mxu1 %vm768_vm1, %v767_v3  ;;  %704 = vmatmul.mubr.msk.f32.vlgmr.msra.gmra.mrb[4].mxu0 %vm40_vm0, %v30_v6 }
   0xf   :  { %709 = vmatmul.mubr.msk.f32.vlgmr.msra.gmra.mrb[4].mxu1 %vm40_vm0, %v30_v6  ;;  %37 = vperm.xlu0 %717, %v30_v6  }
  0x10   :  { %719 = vset.pattern.permute.xlu1 %v770_v13 }
  0x11   :  { %128 = vperm.xlu1 %719, %v30_v6  }
  0x13   :  { %718 = vset.pattern.permute.xlu0 %v771_v14 }
  0x14   :  { %115 = vperm.xlu0 %718, %v30_v6  }
  0x18   :  { %720 = vset.pattern.permute.xlu0 %v770_v13 }
  0x8e   :  { %v38_v15 = vpop.permute.xlu0 %37 }
  0x90   :  { %v818_v17 = vpop.permute.xlu1 %128 }
  0x91   :  { %v131_v25 = vmul.f32 %v818_v17, %v34_v4  ;;  %v221_v28 = vmul.f32 %v141_v8, %v818_v17  ;;  %v322_v33 = vmul.f32 %v242_v7, %v818_v17  ;;  %v422_v37 = vmul.f32 %v342_v9, %v818_v17 }
  0x92   :  { %v827_v41 = vmul.f32 %v442_v11, %v818_v17 }
  0x93   :  { %v116_v23 = vpop.permute.xlu0 %115  ;;  %v132_v40 = vsel %vm119_vm2, %v131_v25, 0.0  ;;  %v222_v46 = vsel %vm119_vm2, %v221_v28, 0.0  ;;  %v323_v52 = vsel %vm119_vm2, %v322_v33, 0.0  ;;  %v423_v57 = vsel %vm119_vm2, %v422_v37, 0.0 }
  0x94   :  { %v133_v61 = vrot.slane %v132_v40, 4  ;;  %v223_v5 = vrot.slane %v222_v46, 4  ;;  %v324_v9 = vrot.slane %v323_v52, 4  ;;  %v424_v28 = vrot.slane %v423_v57, 4 }
  0x96   :  { %v134_v14 = vadd.f32 %v133_v61, %v132_v40 }
  0xd9   :  { %v109_v16 = vpop.f32.mrb[0].mxu0 }
  0xda   :  { %v110_v18 = vadd.f32 %v109_v16, %v38_v15  ;;  %v208_v19 = vpop.f32.mrb[0].mxu1  ;;  %v685_v20 = vpop.f32.mrb[1].mxu0 }
  0xdb   :  { %v209_v21 = vadd.f32 %v208_v19, %v38_v15  ;;  %v690_v22 = vpop.f32.mrb[1].mxu1 }
  0xdc   :  { %v113_v24 = vmax.f32 %v110_v18, 0.0 }
  0xdd   :  { %v212_v26 = vmax.f32 %v209_v21, 0.0  ;;  %v309_v27 = vpop.f32.mrb[2].mxu0 }
  0xde   :  { %v118_v29 = vmul.f32 %v116_v23, %v113_v24  ;;  %v310_v30 = vadd.f32 %v309_v27, %v38_v15  ;;  %v409_v31 = vpop.f32.mrb[2].mxu1  ;;  %v695_v32 = vpop.f32.mrb[3].mxu0  ;;  %v224_v24 = vadd.f32 %v223_v5, %v222_v46 }
  0xdf   :  { %v213_v34 = vmul.f32 %v212_v26, %v116_v23  ;;  %v410_v35 = vadd.f32 %v409_v31, %v38_v15  ;;  %v700_v36 = vpop.f32.mrb[3].mxu1  ;;  %v325_v31 = vadd.f32 %v324_v9, %v323_v52 }
  0xe0   :  { %v120_v38 = vsel %vm119_vm2, %v118_v29, 0.0  ;;  %v313_v39 = vmax.f32 %v310_v30, 0.0 }
  0xe1   :  { %v121_v42 = vrot.slane %v120_v38, 4  ;;  %v214_v43 = vsel %vm119_vm2, %v213_v34, 0.0  ;;  %v413_v44 = vmax.f32 %v410_v35, 0.0  ;;  %v509_v45 = vpop.f32.mrb[4].mxu0  ;;  %v135_v34 = vrot.slane %v134_v14, 2 }
  0xe2   :  { %v215_v47 = vrot.slane %v214_v43, 4  ;;  %v314_v48 = vmul.f32 %v313_v39, %v116_v23  ;;  %v510_v49 = vadd.f32 %v509_v45, %v38_v15  ;;  %v609_v50 = vpop.f32.mrb[4].mxu1  ;;  %v705_v51 = vpop.f32.mrb[5].mxu0  ;;  %v622_v35 = vmul.f32 %v807_v12, %v818_v17 }
  0xe3   :  { %v122_v53 = vadd.f32 %v121_v42, %v120_v38  ;;  %v414_v54 = vmul.f32 %v413_v44, %v116_v23  ;;  %v610_v55 = vadd.f32 %v609_v50, %v38_v15  ;;  %v710_v56 = vpop.f32.mrb[5].mxu1  ;;  %v225_v39 = vrot.slane %v224_v24, 2 }
  0xe4   :  { %v216_v58 = vadd.f32 %v215_v47, %v214_v43  ;;  %v315_v59 = vsel %vm119_vm2, %v314_v48, 0.0  ;;  %v513_v60 = vmax.f32 %v510_v49, 0.0  ;;  %v425_v43 = vadd.f32 %v424_v28, %v423_v57 }
  0xe5   :  { %v123_v62 = vrot.slane %v122_v53, 2  ;;  %v316_v63 = vrot.slane %v315_v59, 4  ;;  %v415_v0 = vsel %vm119_vm2, %v414_v54, 0.0  ;;  %v613_v1 = vmax.f32 %v610_v55, 0.0 }
  0xe6   :  { %v217_v2 = vrot.slane %v216_v58, 2  ;;  %v416_v3 = vrot.slane %v415_v0, 4  ;;  %v514_v4 = vmul.f32 %v513_v60, %v116_v23  ;;  %v523_v44 = vsel %vm119_vm2, %v827_v41, 0.0 }
  0xe7   :  { %v124_v6 = vadd.f32 %v123_v62, %v122_v53  ;;  %v317_v7 = vadd.f32 %v316_v63, %v315_v59  ;;  %v614_v8 = vmul.f32 %v613_v1, %v116_v23  ;;  %v326_v48 = vrot.slane %v325_v31, 2 }
  0xe8   :  { %v218_v10 = vadd.f32 %v217_v2, %v216_v58  ;;  %v417_v11 = vadd.f32 %v416_v3, %v415_v0  ;;  %v515_v13 = vsel %vm119_vm2, %v514_v4, 0.0  ;;  %v136_v52 = vadd.f32 %v135_v34, %v134_v14 }
  0xe9   :  { %v125_v15 = vrot.slane %v124_v6, 1  ;;  %v318_v16 = vrot.slane %v317_v7, 2  ;;  %v516_v18 = vrot.slane %v515_v13, 4  ;;  %v615_v19 = vsel %vm119_vm2, %v614_v8, 0.0 }
  0xea   :  { %v219_v20 = vrot.slane %v218_v10, 1  ;;  %v418_v21 = vrot.slane %v417_v11, 2  ;;  %v616_v22 = vrot.slane %v615_v19, 4  ;;  %v226_v54 = vadd.f32 %v225_v39, %v224_v24 }
  0xeb   :  { %v126_v25 = vadd.f32 %v125_v15, %v124_v6  ;;  %v319_v26 = vadd.f32 %v318_v16, %v317_v7  ;;  %v517_v27 = vadd.f32 %v516_v18, %v515_v13  ;;  %v426_v57 = vrot.slane %v425_v43, 2 }
  0xec   :  { %v220_v23 = vadd.f32 %v219_v20, %v218_v10  ;;  %v419_v29 = vadd.f32 %v418_v21, %v417_v11  ;;  %v617_v30 = vadd.f32 %v616_v22, %v615_v19  ;;  %v524_v60 = vrot.slane %v523_v44, 4 }
  0xed   :  { %v320_v32 = vrot.slane %v319_v26, 1  ;;  %v518_v33 = vrot.slane %v517_v27, 2  ;;  %v623_v41 = vsel %vm119_vm2, %v622_v35, 0.0  ;;  %v137_v2 = vrot.slane %v136_v52, 1 }
  0xee   :  { %v229_v36 = vmax.f32 %v126_v25, %v220_v23  ;;  %v420_v37 = vrot.slane %v419_v29, 1  ;;  %v618_v38 = vrot.slane %v617_v30, 2  ;;  %v327_v3 = vadd.f32 %v326_v48, %v325_v31 }
  0xef   :  { %v321_v40 = vadd.f32 %v320_v32, %v319_v26  ;;  %v519_v42 = vadd.f32 %v518_v33, %v517_v27  ;;  %v227_v6 = vrot.slane %v226_v54, 1  ;;  %v525_v11 = vadd.f32 %v524_v60, %v523_v44 }
  0xf0   :  { %v230_v45 = vsub.f32 %v126_v25, %v229_v36  ;;  %v233_v46 = vsub.f32 %v220_v23, %v229_v36  ;;  %v619_v47 = vadd.f32 %v618_v38, %v617_v30  ;;  %v421_v50 = vadd.f32 %v420_v37, %v419_v29 }
  0xf1   :  { %v330_v49 = vmax.f32 %v229_v36, %v321_v40  ;;  %v520_v51 = vrot.slane %v519_v42, 1  ;;  %v624_v13 = vrot.slane %v623_v41, 4  ;;  %v138_v15 = vadd.f32 %v137_v2, %v136_v52 }
  0xf2   :  { %v231_v53 = vmul.f32 1.442695, %v230_v45  ;;  %v234_v12 = vmul.f32 1.442695, %v233_v46  ;;  %v620_v17 = vrot.slane %v619_v47, 1  ;;  %v328_v16 = vrot.slane %v327_v3, 1 }
  0xf3   :  { %v331_v55 = vsub.f32 %v229_v36, %v330_v49  ;;  %v334_v56 = vsub.f32 %v321_v40, %v330_v49  ;;  %v430_v58 = vmax.f32 %v330_v49, %v421_v50  ;;  %v521_v59 = vadd.f32 %v520_v51, %v519_v42 }
  0xf4   :  { %721 = vpow2.f32 %v231_v53  ;;  %v621_v5 = vadd.f32 %v620_v17, %v619_v47  ;;  %v228_v21 = vadd.f32 %v227_v6, %v226_v54  ;;  %v427_v22 = vadd.f32 %v426_v57, %v425_v43 }
  0xf5   :  { %723 = vpow2.f32 %v234_v12  ;;  %v332_v61 = vmul.f32 1.442695, %v331_v55  ;;  %v335_v62 = vmul.f32 1.442695, %v334_v56  ;;  %v431_v63 = vsub.f32 %v330_v49, %v430_v58 }
  0xf6   :  { %v434_v0 = vsub.f32 %v421_v50, %v430_v58  ;;  %v530_v1 = vmax.f32 %v430_v58, %v521_v59  ;;  %v625_v24 = vadd.f32 %v624_v13, %v623_v41  ;;  %v526_v27 = vrot.slane %v525_v11, 2 }
  0xf7   :  { %725 = vpow2.f32 %v332_v61  ;;  %v432_v4 = vmul.f32 1.442695, %v431_v63  ;;  %v329_v30 = vadd.f32 %v328_v16, %v327_v3  ;;  %v428_v33 = vrot.slane %v427_v22, 1 }
  0xf8   :  { %727 = vpow2.f32 %v335_v62  ;;  %v435_v7 = vmul.f32 1.442695, %v434_v0  ;;  %v531_v8 = vsub.f32 %v430_v58, %v530_v1  ;;  %v534_v9 = vsub.f32 %v521_v59, %v530_v1 }
  0xf9   :  { %v630_v10 = vmax.f32 %v530_v1, %v621_v5  ;;  %729 = vpow2.f32 %v432_v4  ;;  %v626_v35 = vrot.slane %v625_v24, 2  ;;  %v527_v39 = vadd.f32 %v526_v27, %v525_v11 }
  0xfa   :  { %v532_v14 = vmul.f32 1.442695, %v531_v8  ;;  %731 = vpow2.f32 %v435_v7  ;;  %v535_v18 = vmul.f32 1.442695, %v534_v9  ;;  %v429_v44 = vadd.f32 %v428_v33, %v427_v22 }
  0xfb   :  { %v631_v19 = vsub.f32 %v530_v1, %v630_v10  ;;  %v634_v20 = vsub.f32 %v621_v5, %v630_v10  ;;  %v528_v47 = vrot.slane %v527_v39, 1  ;;  %v627_v50 = vadd.f32 %v626_v35, %v625_v24 }
  0xfc   :  { %733 = vpow2.f32 %v532_v14 }
  0xfd   :  { %v632_v26 = vmul.f32 1.442695, %v631_v19  ;;  %735 = vpow2.f32 %v535_v18  ;;  %v635_v23 = vmul.f32 1.442695, %v634_v20  ;;  %v529_v55 = vadd.f32 %v528_v47, %v527_v39 }
  0xfe   :  { %v722_v25 = vpop.eup %721  ;;  %v628_v58 = vrot.slane %v627_v50, 1 }
  0xff   :  { %v724_v28 = vpop.eup %723  ;;  %v237_v29 = vmul.f32 %v722_v25, %v138_v15  ;;  %737 = vpow2.f32 %v632_v26 }
 0x100   :  { %v236_v31 = vadd.f32 %v724_v28, %v722_v25  ;;  %v238_v32 = vmul.f32 %v724_v28, %v228_v21  ;;  %739 = vpow2.f32 %v635_v23  ;;  %v629_v63 = vadd.f32 %v628_v58, %v627_v50 }
 0x101   :  { %v726_v34 = vpop.eup %725 }
 0x102   :  { %v728_v36 = vpop.eup %727  ;;  %v337_v37 = vmul.f32 %v726_v34, %v236_v31  ;;  %v239_v38 = vadd.f32 %v238_v32, %v237_v29 }
 0x103   :  { %v340_v40 = vmul.f32 %v728_v36, %v329_v30  ;;  %v730_v42 = vpop.eup %729 }
 0x104   :  { %v338_v43 = vadd.f32 %v728_v36, %v337_v37  ;;  %v339_v45 = vmul.f32 %v726_v34, %v239_v38  ;;  %v732_v46 = vpop.eup %731 }
 0x105   :  { %v440_v12 = vmul.f32 %v732_v46, %v429_v44 }
 0x106   :  { %v341_v48 = vadd.f32 %v340_v40, %v339_v45  ;;  %v437_v49 = vmul.f32 %v730_v42, %v338_v43  ;;  %v734_v51 = vpop.eup %733 }
 0x107   :  { %v736_v17 = vpop.eup %735 }
 0x108   :  { %v438_v52 = vadd.f32 %v732_v46, %v437_v49  ;;  %v439_v53 = vmul.f32 %v730_v42, %v341_v48  ;;  %v540_v41 = vmul.f32 %v736_v17, %v529_v55 }
 0x109   :  { %v738_v59 = vpop.eup %737 }
 0x10a   :  { %v441_v54 = vadd.f32 %v440_v12, %v439_v53  ;;  %v537_v56 = vmul.f32 %v734_v51, %v438_v52  ;;  %v740_v61 = vpop.eup %739 }
 0x10b   :  { %v640_v3 = vmul.f32 %v740_v61, %v629_v63 }
 0x10c   :  { %v538_v57 = vadd.f32 %v736_v17, %v537_v56  ;;  %v539_v60 = vmul.f32 %v734_v51, %v441_v54 }
 0x10e   :  { %v541_v62 = vadd.f32 %v540_v41, %v539_v60  ;;  %v637_v0 = vmul.f32 %v738_v59, %v538_v57 }
 0x110   :  { %v638_v1 = vadd.f32 %v740_v61, %v637_v0  ;;  %v639_v2 = vmul.f32 %v738_v59, %v541_v62 }
 0x112   :  { %v641_v4 = vadd.f32 %v640_v3, %v639_v2  ;;  %741 = vrcp.f32 %v638_v1 }
 0x11c   :  { %v742_v5 = vpop.eup %741 }
 0x11d   :  { %v643_v6 = vmul.f32 %v742_v5, %v641_v4 }
 0x11f   :  { %645 = vst.msk [vmem:[#allocation2] sm:$0x1] %vm644_vm3, %v643_v6 }
 0x120   :  { %754 = shalt.err (!%p751_p4)
}
 0x121   :  { %s755_s23 = scalar_lea.hbm %s856_s2, 16 }
 0x122   :  { %p756_p5 = scmp.ne.s32.totalorder %s856_s2, %s755_s23  ;;  %p759_p6 = scmp.lt.u32.totalorder %s755_s23, %s856_s2 }
 0x124   :  { %p761_p7 = pnand %p759_p6, %p756_p5 }
 0x126   :  { %764 = shalt.err (!%p761_p7)
}
 0x127   :  { %655 = dma.vmem_to_hbm [thread:$0]  %s653_s1, 16, %s856_s2, [#allocation3]  }
 0x128   :  { %765 = dma.done.wait [#allocation3], 16  }
 0x129   :  { %766 = vsyncadd [#allocation3], 4294967280 }
 0x12a   :  { %659 = vsyncpa [#allocation3], 1 }

// kernel: afm_layer_pallas.1
= control target key start
LH: loop header
LB: loop body
LE: loop exit
PB: predicated region body
PF: predicated region fallthrough
CT: control target
= control target key end

     0   :  { %v749_v3 = vmov 0.0   ;;  %vm22_vm0 = vcmask 64512   ;;  %s836_s0 = inlined_call_operand.vmem [shape: f32[4,8,2], index: 0, kind: input, shape index: {}]   ;;  %s837_s1 = inlined_call_operand.vmem [shape: f32[8,11], index: 1, kind: input, shape index: {}]   ;;  %s838_s2 = inlined_call_operand.hbm [shape: f32[1,2], index: 2, kind: output, shape index: {}]  }
   0x1   :  { %v13_v0 = vld [vmem:[%s836_s0] sm:$0xff]  ;;  %v642_v1 = vld [vmem:[%s836_s0 + $0x8] sm:$0xff]  ;;  %v646_v2 = vld [vmem:[%s836_s0 + $0x18] sm:$0xff]  ;;  %663 = vmatprep.subr.mxu0 %v749_v3  ;;  %668 = vmatprep.subr.mxu1 %v749_v3 }
   0x2   :  { %v16_v4 = vmul.f32 %v642_v1, %v13_v0  ;;  %v644_v5 = vld [vmem:[%s836_s0 + $0x10] sm:$0xff]  ;;  %v12_v6 = vld [vmem:[%s837_s1] sm:$0xff] }
   0x3   :  { %7 = vsyncpa [#allocation3], 0  ;;  %v224_v7 = vmul.f32 %v646_v2, %v13_v0  ;;  %vm750_vm1 = vmmov 0   ;;  %v123_v8 = vmul.f32 %v644_v5, %v13_v0  ;;  %v324_v9 = vmul.f32 %v644_v5, %v642_v1  ;;  %s754_s0 = smov [#allocation2]  }
   0x4   :  { %665 = vmatprep.mubr.msk.f32.mxu0 %vm750_vm1, %v749_v3  ;;  %670 = vmatprep.mubr.msk.f32.mxu1 %vm750_vm1, %v749_v3  ;;  %v751_v10 = vmov 8   ;;  %v424_v11 = vmul.f32 %v646_v2, %v642_v1  ;;  %v789_v12 = vmul.f32 %v646_v2, %v644_v5  ;;  %v752_v13 = vmov 10   ;;  %s634_s1 = sshll.u32 %s754_s0, 4  ;;  %s635_s1 = int_to_ptr.vmem [resolvable:$true] %s634_s1 }
   0x5   :  { %664 = vmatpush3.msra.mxu0 %v16_v4  ;;  %699 = vset.pattern.permute.xlu0 %v751_v10  ;;  %v753_v14 = vmov 9   ;;  %vm101_vm2 = vcmask 15360   ;;  %vm626_vm3 = vcmask 8192   ;;  %s725_s19 = scalar_lea.vmem %s635_s1, 16  ;;  %s729_s20 = scalar_lea.vmem %s635_s1, 32 }
   0x6   :  { %669 = vmatpush3.msra.mxu1 %v123_v8  ;;  %666 = vmatmul.mubr.msk.f32.vlgmr.msra.gmra.mrb[0].mxu0 %vm22_vm0, %v12_v6  ;;  %p726_p0 = scmp.ne.s32.totalorder %s635_s1, %s725_s19  ;;  %p730_p1 = scmp.lt.s32.totalorder %s635_s1, %s635_s1 }
   0x7   :  { %671 = vmatmul.mubr.msk.f32.vlgmr.msra.gmra.mrb[0].mxu1 %vm22_vm0, %v12_v6  ;;  %673 = vmatprep.subr.mxu0 %v749_v3  ;;  %p731_p2 = scmp.lt.s32.totalorder %s729_s20, %s725_s19 }
   0x8   :  { %674 = vmatpush3.msra.mxu0 %v224_v7  ;;  %678 = vmatprep.subr.mxu1 %v749_v3 }
   0x9   :  { %675 = vmatprep.mubr.msk.f32.mxu0 %vm750_vm1, %v749_v3  ;;  %679 = vmatpush3.msra.mxu1 %v324_v9  ;;  %p732_p3 = por %p731_p2, %p730_p1 }
   0xa   :  { %680 = vmatprep.mubr.msk.f32.mxu1 %vm750_vm1, %v749_v3  ;;  %676 = vmatmul.mubr.msk.f32.vlgmr.msra.gmra.mrb[2].mxu0 %vm22_vm0, %v12_v6 }
   0xb   :  { %681 = vmatmul.mubr.msk.f32.vlgmr.msra.gmra.mrb[2].mxu1 %vm22_vm0, %v12_v6  ;;  %683 = vmatprep.subr.mxu0 %v749_v3  ;;  %p733_p4 = pnand %p732_p3, %p726_p0 }
   0xc   :  { %688 = vmatprep.subr.mxu1 %v749_v3  ;;  %684 = vmatpush3.msra.mxu0 %v424_v11 }
   0xd   :  { %685 = vmatprep.mubr.msk.f32.mxu0 %vm750_vm1, %v749_v3  ;;  %689 = vmatpush3.msra.mxu1 %v789_v12 }
   0xe   :  { %690 = vmatprep.mubr.msk.f32.mxu1 %vm750_vm1, %v749_v3  ;;  %686 = vmatmul.mubr.msk.f32.vlgmr.msra.gmra.mrb[4].mxu0 %vm22_vm0, %v12_v6 }
   0xf   :  { %691 = vmatmul.mubr.msk.f32.vlgmr.msra.gmra.mrb[4].mxu1 %vm22_vm0, %v12_v6  ;;  %19 = vperm.xlu0 %699, %v12_v6  }
  0x10   :  { %701 = vset.pattern.permute.xlu1 %v752_v13 }
  0x11   :  { %110 = vperm.xlu1 %701, %v12_v6  }
  0x13   :  { %700 = vset.pattern.permute.xlu0 %v753_v14 }
  0x14   :  { %97 = vperm.xlu0 %700, %v12_v6  }
  0x18   :  { %702 = vset.pattern.permute.xlu0 %v752_v13 }
  0x8e   :  { %v20_v15 = vpop.permute.xlu0 %19 }
  0x90   :  { %v800_v17 = vpop.permute.xlu1 %110 }
  0x91   :  { %v113_v25 = vmul.f32 %v800_v17, %v16_v4  ;;  %v203_v28 = vmul.f32 %v123_v8, %v800_v17  ;;  %v304_v33 = vmul.f32 %v224_v7, %v800_v17  ;;  %v404_v37 = vmul.f32 %v324_v9, %v800_v17 }
  0x92   :  { %v809_v41 = vmul.f32 %v424_v11, %v800_v17 }
  0x93   :  { %v98_v23 = vpop.permute.xlu0 %97  ;;  %v114_v40 = vsel %vm101_vm2, %v113_v25, 0.0  ;;  %v204_v46 = vsel %vm101_vm2, %v203_v28, 0.0  ;;  %v305_v52 = vsel %vm101_vm2, %v304_v33, 0.0  ;;  %v405_v57 = vsel %vm101_vm2, %v404_v37, 0.0 }
  0x94   :  { %v115_v61 = vrot.slane %v114_v40, 4  ;;  %v205_v5 = vrot.slane %v204_v46, 4  ;;  %v306_v9 = vrot.slane %v305_v52, 4  ;;  %v406_v28 = vrot.slane %v405_v57, 4 }
  0x96   :  { %v116_v14 = vadd.f32 %v115_v61, %v114_v40 }
  0xd9   :  { %v91_v16 = vpop.f32.mrb[0].mxu0 }
  0xda   :  { %v92_v18 = vadd.f32 %v91_v16, %v20_v15  ;;  %v190_v19 = vpop.f32.mrb[0].mxu1  ;;  %v667_v20 = vpop.f32.mrb[1].mxu0 }
  0xdb   :  { %v191_v21 = vadd.f32 %v190_v19, %v20_v15  ;;  %v672_v22 = vpop.f32.mrb[1].mxu1 }
  0xdc   :  { %v95_v24 = vmax.f32 %v92_v18, 0.0 }
  0xdd   :  { %v194_v26 = vmax.f32 %v191_v21, 0.0  ;;  %v291_v27 = vpop.f32.mrb[2].mxu0 }
  0xde   :  { %v100_v29 = vmul.f32 %v98_v23, %v95_v24  ;;  %v292_v30 = vadd.f32 %v291_v27, %v20_v15  ;;  %v391_v31 = vpop.f32.mrb[2].mxu1  ;;  %v677_v32 = vpop.f32.mrb[3].mxu0  ;;  %v206_v24 = vadd.f32 %v205_v5, %v204_v46 }
  0xdf   :  { %v195_v34 = vmul.f32 %v194_v26, %v98_v23  ;;  %v392_v35 = vadd.f32 %v391_v31, %v20_v15  ;;  %v682_v36 = vpop.f32.mrb[3].mxu1  ;;  %v307_v31 = vadd.f32 %v306_v9, %v305_v52 }
  0xe0   :  { %v102_v38 = vsel %vm101_vm2, %v100_v29, 0.0  ;;  %v295_v39 = vmax.f32 %v292_v30, 0.0 }
  0xe1   :  { %v103_v42 = vrot.slane %v102_v38, 4  ;;  %v196_v43 = vsel %vm101_vm2, %v195_v34, 0.0  ;;  %v395_v44 = vmax.f32 %v392_v35, 0.0  ;;  %v491_v45 = vpop.f32.mrb[4].mxu0  ;;  %v117_v34 = vrot.slane %v116_v14, 2 }
  0xe2   :  { %v197_v47 = vrot.slane %v196_v43, 4  ;;  %v296_v48 = vmul.f32 %v295_v39, %v98_v23  ;;  %v492_v49 = vadd.f32 %v491_v45, %v20_v15  ;;  %v591_v50 = vpop.f32.mrb[4].mxu1  ;;  %v687_v51 = vpop.f32.mrb[5].mxu0  ;;  %v604_v35 = vmul.f32 %v789_v12, %v800_v17 }
  0xe3   :  { %v104_v53 = vadd.f32 %v103_v42, %v102_v38  ;;  %v396_v54 = vmul.f32 %v395_v44, %v98_v23  ;;  %v592_v55 = vadd.f32 %v591_v50, %v20_v15  ;;  %v692_v56 = vpop.f32.mrb[5].mxu1  ;;  %v207_v39 = vrot.slane %v206_v24, 2 }
  0xe4   :  { %v198_v58 = vadd.f32 %v197_v47, %v196_v43  ;;  %v297_v59 = vsel %vm101_vm2, %v296_v48, 0.0  ;;  %v495_v60 = vmax.f32 %v492_v49, 0.0  ;;  %v407_v43 = vadd.f32 %v406_v28, %v405_v57 }
  0xe5   :  { %v105_v62 = vrot.slane %v104_v53, 2  ;;  %v298_v63 = vrot.slane %v297_v59, 4  ;;  %v397_v0 = vsel %vm101_vm2, %v396_v54, 0.0  ;;  %v595_v1 = vmax.f32 %v592_v55, 0.0 }
  0xe6   :  { %v199_v2 = vrot.slane %v198_v58, 2  ;;  %v398_v3 = vrot.slane %v397_v0, 4  ;;  %v496_v4 = vmul.f32 %v495_v60, %v98_v23  ;;  %v505_v44 = vsel %vm101_vm2, %v809_v41, 0.0 }
  0xe7   :  { %v106_v6 = vadd.f32 %v105_v62, %v104_v53  ;;  %v299_v7 = vadd.f32 %v298_v63, %v297_v59  ;;  %v596_v8 = vmul.f32 %v595_v1, %v98_v23  ;;  %v308_v48 = vrot.slane %v307_v31, 2 }
  0xe8   :  { %v200_v10 = vadd.f32 %v199_v2, %v198_v58  ;;  %v399_v11 = vadd.f32 %v398_v3, %v397_v0  ;;  %v497_v13 = vsel %vm101_vm2, %v496_v4, 0.0  ;;  %v118_v52 = vadd.f32 %v117_v34, %v116_v14 }
  0xe9   :  { %v107_v15 = vrot.slane %v106_v6, 1  ;;  %v300_v16 = vrot.slane %v299_v7, 2  ;;  %v498_v18 = vrot.slane %v497_v13, 4  ;;  %v597_v19 = vsel %vm101_vm2, %v596_v8, 0.0 }
  0xea   :  { %v201_v20 = vrot.slane %v200_v10, 1  ;;  %v400_v21 = vrot.slane %v399_v11, 2  ;;  %v598_v22 = vrot.slane %v597_v19, 4  ;;  %v208_v54 = vadd.f32 %v207_v39, %v206_v24 }
  0xeb   :  { %v108_v25 = vadd.f32 %v107_v15, %v106_v6  ;;  %v301_v26 = vadd.f32 %v300_v16, %v299_v7  ;;  %v499_v27 = vadd.f32 %v498_v18, %v497_v13  ;;  %v408_v57 = vrot.slane %v407_v43, 2 }
  0xec   :  { %v202_v23 = vadd.f32 %v201_v20, %v200_v10  ;;  %v401_v29 = vadd.f32 %v400_v21, %v399_v11  ;;  %v599_v30 = vadd.f32 %v598_v22, %v597_v19  ;;  %v506_v60 = vrot.slane %v505_v44, 4 }
  0xed   :  { %v302_v32 = vrot.slane %v301_v26, 1  ;;  %v500_v33 = vrot.slane %v499_v27, 2  ;;  %v605_v41 = vsel %vm101_vm2, %v604_v35, 0.0  ;;  %v119_v2 = vrot.slane %v118_v52, 1 }
  0xee   :  { %v211_v36 = vmax.f32 %v108_v25, %v202_v23  ;;  %v402_v37 = vrot.slane %v401_v29, 1  ;;  %v600_v38 = vrot.slane %v599_v30, 2  ;;  %v309_v3 = vadd.f32 %v308_v48, %v307_v31 }
  0xef   :  { %v303_v40 = vadd.f32 %v302_v32, %v301_v26  ;;  %v501_v42 = vadd.f32 %v500_v33, %v499_v27  ;;  %v209_v6 = vrot.slane %v208_v54, 1  ;;  %v507_v11 = vadd.f32 %v506_v60, %v505_v44 }
  0xf0   :  { %v212_v45 = vsub.f32 %v108_v25, %v211_v36  ;;  %v215_v46 = vsub.f32 %v202_v23, %v211_v36  ;;  %v601_v47 = vadd.f32 %v600_v38, %v599_v30  ;;  %v403_v50 = vadd.f32 %v402_v37, %v401_v29 }
  0xf1   :  { %v312_v49 = vmax.f32 %v211_v36, %v303_v40  ;;  %v502_v51 = vrot.slane %v501_v42, 1  ;;  %v606_v13 = vrot.slane %v605_v41, 4  ;;  %v120_v15 = vadd.f32 %v119_v2, %v118_v52 }
  0xf2   :  { %v213_v53 = vmul.f32 1.442695, %v212_v45  ;;  %v216_v12 = vmul.f32 1.442695, %v215_v46  ;;  %v602_v17 = vrot.slane %v601_v47, 1  ;;  %v310_v16 = vrot.slane %v309_v3, 1 }
  0xf3   :  { %v313_v55 = vsub.f32 %v211_v36, %v312_v49  ;;  %v316_v56 = vsub.f32 %v303_v40, %v312_v49  ;;  %v412_v58 = vmax.f32 %v312_v49, %v403_v50  ;;  %v503_v59 = vadd.f32 %v502_v51, %v501_v42 }
  0xf4   :  { %703 = vpow2.f32 %v213_v53  ;;  %v603_v5 = vadd.f32 %v602_v17, %v601_v47  ;;  %v210_v21 = vadd.f32 %v209_v6, %v208_v54  ;;  %v409_v22 = vadd.f32 %v408_v57, %v407_v43 }
  0xf5   :  { %705 = vpow2.f32 %v216_v12  ;;  %v314_v61 = vmul.f32 1.442695, %v313_v55  ;;  %v317_v62 = vmul.f32 1.442695, %v316_v56  ;;  %v413_v63 = vsub.f32 %v312_v49, %v412_v58 }
  0xf6   :  { %v416_v0 = vsub.f32 %v403_v50, %v412_v58  ;;  %v512_v1 = vmax.f32 %v412_v58, %v503_v59  ;;  %v607_v24 = vadd.f32 %v606_v13, %v605_v41  ;;  %v508_v27 = vrot.slane %v507_v11, 2 }
  0xf7   :  { %707 = vpow2.f32 %v314_v61  ;;  %v414_v4 = vmul.f32 1.442695, %v413_v63  ;;  %v311_v30 = vadd.f32 %v310_v16, %v309_v3  ;;  %v410_v33 = vrot.slane %v409_v22, 1 }
  0xf8   :  { %709 = vpow2.f32 %v317_v62  ;;  %v417_v7 = vmul.f32 1.442695, %v416_v0  ;;  %v513_v8 = vsub.f32 %v412_v58, %v512_v1  ;;  %v516_v9 = vsub.f32 %v503_v59, %v512_v1 }
  0xf9   :  { %v612_v10 = vmax.f32 %v512_v1, %v603_v5  ;;  %711 = vpow2.f32 %v414_v4  ;;  %v608_v35 = vrot.slane %v607_v24, 2  ;;  %v509_v39 = vadd.f32 %v508_v27, %v507_v11 }
  0xfa   :  { %v514_v14 = vmul.f32 1.442695, %v513_v8  ;;  %713 = vpow2.f32 %v417_v7  ;;  %v517_v18 = vmul.f32 1.442695, %v516_v9  ;;  %v411_v44 = vadd.f32 %v410_v33, %v409_v22 }
  0xfb   :  { %v613_v19 = vsub.f32 %v512_v1, %v612_v10  ;;  %v616_v20 = vsub.f32 %v603_v5, %v612_v10  ;;  %v510_v47 = vrot.slane %v509_v39, 1  ;;  %v609_v50 = vadd.f32 %v608_v35, %v607_v24 }
  0xfc   :  { %715 = vpow2.f32 %v514_v14 }
  0xfd   :  { %v614_v26 = vmul.f32 1.442695, %v613_v19  ;;  %717 = vpow2.f32 %v517_v18  ;;  %v617_v23 = vmul.f32 1.442695, %v616_v20  ;;  %v511_v55 = vadd.f32 %v510_v47, %v509_v39 }
  0xfe   :  { %v704_v25 = vpop.eup %703  ;;  %v610_v58 = vrot.slane %v609_v50, 1 }
  0xff   :  { %v706_v28 = vpop.eup %705  ;;  %v219_v29 = vmul.f32 %v704_v25, %v120_v15  ;;  %719 = vpow2.f32 %v614_v26 }
 0x100   :  { %v218_v31 = vadd.f32 %v706_v28, %v704_v25  ;;  %v220_v32 = vmul.f32 %v706_v28, %v210_v21  ;;  %721 = vpow2.f32 %v617_v23  ;;  %v611_v63 = vadd.f32 %v610_v58, %v609_v50 }
 0x101   :  { %v708_v34 = vpop.eup %707 }
 0x102   :  { %v710_v36 = vpop.eup %709  ;;  %v319_v37 = vmul.f32 %v708_v34, %v218_v31  ;;  %v221_v38 = vadd.f32 %v220_v32, %v219_v29 }
 0x103   :  { %v322_v40 = vmul.f32 %v710_v36, %v311_v30  ;;  %v712_v42 = vpop.eup %711 }
 0x104   :  { %v320_v43 = vadd.f32 %v710_v36, %v319_v37  ;;  %v321_v45 = vmul.f32 %v708_v34, %v221_v38  ;;  %v714_v46 = vpop.eup %713 }
 0x105   :  { %v422_v12 = vmul.f32 %v714_v46, %v411_v44 }
 0x106   :  { %v323_v48 = vadd.f32 %v322_v40, %v321_v45  ;;  %v419_v49 = vmul.f32 %v712_v42, %v320_v43  ;;  %v716_v51 = vpop.eup %715 }
 0x107   :  { %v718_v17 = vpop.eup %717 }
 0x108   :  { %v420_v52 = vadd.f32 %v714_v46, %v419_v49  ;;  %v421_v53 = vmul.f32 %v712_v42, %v323_v48  ;;  %v522_v41 = vmul.f32 %v718_v17, %v511_v55 }
 0x109   :  { %v720_v59 = vpop.eup %719 }
 0x10a   :  { %v423_v54 = vadd.f32 %v422_v12, %v421_v53  ;;  %v519_v56 = vmul.f32 %v716_v51, %v420_v52  ;;  %v722_v61 = vpop.eup %721 }
 0x10b   :  { %v622_v3 = vmul.f32 %v722_v61, %v611_v63 }
 0x10c   :  { %v520_v57 = vadd.f32 %v718_v17, %v519_v56  ;;  %v521_v60 = vmul.f32 %v716_v51, %v423_v54 }
 0x10e   :  { %v523_v62 = vadd.f32 %v522_v41, %v521_v60  ;;  %v619_v0 = vmul.f32 %v720_v59, %v520_v57 }
 0x110   :  { %v620_v1 = vadd.f32 %v722_v61, %v619_v0  ;;  %v621_v2 = vmul.f32 %v720_v59, %v523_v62 }
 0x112   :  { %v623_v4 = vadd.f32 %v622_v3, %v621_v2  ;;  %723 = vrcp.f32 %v620_v1 }
 0x11c   :  { %v724_v5 = vpop.eup %723 }
 0x11d   :  { %v625_v6 = vmul.f32 %v724_v5, %v623_v4 }
 0x11f   :  { %627 = vst.msk [vmem:[#allocation2] sm:$0x1] %vm626_vm3, %v625_v6 }
 0x120   :  { %736 = shalt.err (!%p733_p4)
}
 0x121   :  { %s737_s23 = scalar_lea.hbm %s838_s2, 16 }
 0x122   :  { %p738_p5 = scmp.ne.s32.totalorder %s838_s2, %s737_s23  ;;  %p741_p6 = scmp.lt.u32.totalorder %s737_s23, %s838_s2 }
 0x124   :  { %p743_p7 = pnand %p741_p6, %p738_p5 }
 0x126   :  { %746 = shalt.err (!%p743_p7)
}
 0x127   :  { %637 = dma.vmem_to_hbm [thread:$0]  %s635_s1, 16, %s838_s2, [#allocation3]  }
 0x128   :  { %747 = dma.done.wait [#allocation3], 16  }
 0x129   :  { %748 = vsyncadd [#allocation3], 4294967280 }
 0x12a   :  { %641 = vsyncpa [#allocation3], 1 }

</bundles_post_ra>
